<compile_context>
chip_gen: v6e
topology: v6e:2x2x1
jax: 0.10.0
libtpu: 0.0.40
codegen_flags: <defaults>
</compile_context>

<pallas_src>
import functools
import math

import jax
import jax.numpy as jnp
from jax import lax
from jax.experimental import pallas as pl
from jax.experimental.pallas import tpu as pltpu


def _round_up(x, m):
    return ((x + m - 1) // m) * m


def _cdiv(a, b):
    return -(-a // b)


_VMEM_BUDGET = 26 * 1024 * 1024   # target for the double-buffered working set
_VMEM_LIMIT = 32 * 1024 * 1024    # scoped VMEM limit (≤ physical on v5e/v6e/v7x)


# ----------------------------------------------------------------------------- kernels
def _gcn_kernel_resident(d_ref, adj_ref, sxw_ref, out_ref, *, tm, tk, n, col_mask):
    """Resident-RHS variant: the whole (d ⊙ XW) matrix lives in VMEM; only the raw
    adjacency streams from HBM.  out_ref (f32, block index constant across k) doubles
    as the accumulator."""
    i = pl.program_id(0)
    k = pl.program_id(1)

    @pl.when(k == 0)
    def _init():
        out_ref[...] = jnp.zeros_like(out_ref)

    a = adj_ref[...]
    if col_mask:
        # Ragged last k tile of the UNPADDED adjacency: zero out-of-range columns so
        # stale VMEM contents never reach the MXU.
        col_ids = k * tk + lax.broadcasted_iota(jnp.int32, (1, tk), 1)
        a = jnp.where(col_ids < n, a, jnp.zeros_like(a))
    a = a.astype(jnp.float32)

    rhs = sxw_ref[pl.ds(pl.multiple_of(k * tk, 128), tk), :]        # (tk, F) k slice
    out_ref[...] += jnp.dot(a, rhs, preferred_element_type=jnp.float32)

    @pl.when(k == pl.num_programs(1) - 1)
    def _finalize():
        sxw_i = sxw_ref[pl.ds(pl.multiple_of(i * tm, 128), tm), :]  # self-loop rows
        out_ref[...] = (d_ref[...] * (out_ref[...] + sxw_i)).astype(out_ref.dtype)


def _gcn_kernel_streaming(d_ref, adj_ref, sxw_k_ref, sxw_i_ref, out_ref, *,
                          tk, n, col_mask):
    """Fallback when (d ⊙ XW) does not fit VMEM: a (tk, F) RHS tile streams per k."""
    k = pl.program_id(1)

    @pl.when(k == 0)
    def _init():
        out_ref[...] = jnp.zeros_like(out_ref)

    a = adj_ref[...]
    if col_mask:
        col_ids = k * tk + lax.broadcasted_iota(jnp.int32, (1, tk), 1)
        a = jnp.where(col_ids < n, a, jnp.zeros_like(a))
    a = a.astype(jnp.float32)

    out_ref[...] += jnp.dot(a, sxw_k_ref[...], preferred_element_type=jnp.float32)

    @pl.when(k == pl.num_programs(1) - 1)
    def _finalize():
        out_ref[...] = (d_ref[...] * (out_ref[...] + sxw_i_ref[...])).astype(out_ref.dtype)


# ----------------------------------------------------------------------------- wrapper
@functools.partial(jax.jit,
                   static_argnames=("tm", "tk", "use_bf16_adj", "rhs_resident_max_bytes"))
def graph_convolution(adj, x, weight, *, tm=512, tk=2048, use_bf16_adj=None,
                      rhs_resident_max_bytes=8 * 1024 * 1024):
    """adj: [N, N], x: [N, F_in], weight: [F_in, F_out] -> [N, F_out] (float32)."""
    n = adj.shape[0]
    f_out = weight.shape[1]
    eps = jnp.float32(1e-6)

    # ---- adjacency compute dtype (bf16 is exact for 0/1 edge weights) -------------
    narrow = adj.dtype.name in ("bool", "int8", "uint8", "bfloat16", "float16")
    if use_bf16_adj is None:
        use_bf16_adj = bool(narrow)
    if use_bf16_adj:
        adj_k = adj.astype(jnp.bfloat16)
    else:
        adj_k = adj if adj.dtype == jnp.float32 else adj.astype(jnp.float32)

    # ---- O(N·F) prologue, hoisted out of the tiled kernel --------------------------
    degree = jnp.sum(adj, axis=1, keepdims=True, dtype=jnp.float32)     # [N, 1]
    d = lax.rsqrt(degree + eps)                                          # (deg+eps)^-0.5
    xw = jnp.dot(x.astype(jnp.float32), weight.astype(jnp.float32),
                 preferred_element_type=jnp.float32)                     # [N, F_out]
    sxw = d * xw                                                         # d ⊙ XW

    # ---- tile selection -------------------------------------------------------------
    f_pad = _round_up(max(f_out, 1), 128)
    n128 = _round_up(n, 128)
    tm_eff = min(_round_up(max(tm, 128), 128), n128)
    tk_eff = min(_round_up(max(tk, 128), 128), n128)
    # Keep >= 2 row tiles when possible so the "parallel" row axis can shard across
    # both TensorCores on v7x (no-op on single-TC v5e/v6e).
    if _cdiv(n, tm_eff) < 2 and n128 >= 256:
        tm_eff = _round_up(n128 // 2, 128)

    adj_bytes = 2 if use_bf16_adj else 4

    def _pads(tm_, tk_):
        gr, gk = _cdiv(n, tm_), _cdiv(n, tk_)
        return gr, gk, gr * tm_, gk * tk_, max(gr * tm_, gk * tk_)

    def _vmem_use(tm_, tk_, sxw_rows, resident):
        use = 2 * tm_ * tk_ * adj_bytes              # adj tile, double-buffered
        use += 2 * tm_ * f_pad * 4                   # out tile (accumulator)
        use += 2 * tm_ * 128 * 4                     # d tile (lane-padded)
        if resident:
            use += 2 * sxw_rows * f_pad * 4          # whole d⊙XW (conservative 2 bufs)
        else:
            use += 2 * tk_ * f_pad * 4 + 2 * tm_ * f_pad * 4
        return use

    grid_rows, grid_k, n_rows_pad, n_k_pad, n_sxw_pad = _pads(tm_eff, tk_eff)

    use_resident = (n_sxw_pad * f_pad * 4 <= rhs_resident_max_bytes
                    and _vmem_use(tm_eff, tk_eff, n_sxw_pad, True) <= _VMEM_BUDGET)
    if not use_resident:
        # Shrink tk (then tm) until the streamed working set fits the budget.
        while _vmem_use(tm_eff, tk_eff, 0, False) > _VMEM_BUDGET and tk_eff > 256:
            tk_eff = max(256, _round_up(tk_eff // 2, 128))
        while _vmem_use(tm_eff, tk_eff, 0, False) > _VMEM_BUDGET and tm_eff > 128:
            tm_eff = max(128, _round_up(tm_eff // 2, 128))
        grid_rows, grid_k, n_rows_pad, n_k_pad, n_sxw_pad = _pads(tm_eff, tk_eff)

    col_mask = (n % tk_eff) != 0

    # ---- cheap O(N·F) padding only; the N×N adjacency is NOT copied or padded ------
    d_p = jnp.pad(d, ((0, n_rows_pad - n), (0, 0)))
    sxw_p = jnp.pad(sxw, ((0, n_sxw_pad - n), (0, f_pad - f_out)))

    if use_resident:
        kernel = functools.partial(_gcn_kernel_resident, tm=tm_eff, tk=tk_eff,
                                   n=n, col_mask=col_mask)
        in_specs = [
            pl.BlockSpec((tm_eff, 1), lambda i, k: (i, 0)),           # d   (row tile)
            pl.BlockSpec((tm_eff, tk_eff), lambda i, k: (i, k)),      # raw adj (row, k)
            pl.BlockSpec((n_sxw_pad, f_pad), lambda i, k: (0, 0)),    # d⊙XW, VMEM-resident
        ]
        operands = (d_p, adj_k, sxw_p)
    else:
        kernel = functools.partial(_gcn_kernel_streaming, tk=tk_eff,
                                   n=n, col_mask=col_mask)
        in_specs = [
            pl.BlockSpec((tm_eff, 1), lambda i, k: (i, 0)),           # d   (row tile)
            pl.BlockSpec((tm_eff, tk_eff), lambda i, k: (i, k)),      # raw adj (row, k)
            pl.BlockSpec((tk_eff, f_pad), lambda i, k: (k, 0)),       # d⊙XW (k tile, RHS)
            pl.BlockSpec((tm_eff, f_pad), lambda i, k: (i, 0)),       # d⊙XW (self-loop)
        ]
        operands = (d_p, adj_k, sxw_p, sxw_p)

    out_p = pl.pallas_call(
        kernel,
        out_shape=jax.ShapeDtypeStruct((n_rows_pad, f_pad), jnp.float32),
        grid=(grid_rows, grid_k),
        in_specs=in_specs,
        out_specs=pl.BlockSpec((tm_eff, f_pad), lambda i, k: (i, 0)),
        compiler_params=pltpu.CompilerParams(
            dimension_semantics=("parallel", "arbitrary"),
            vmem_limit_bytes=_VMEM_LIMIT),
    )(*operands)

    return out_p[:n, :f_out]


def reference_gcn(adj, x, weight):
    """Direct transcription of the PyTorch forward, in JAX."""
    eps = 1e-6
    n = adj.shape[0]
    a_tilde = adj + jnp.eye(n, dtype=adj.dtype)
    degree = jnp.sum(adj, axis=1)
    d_inv_sqrt = jnp.diag(jnp.power(degree + eps, -0.5))
    adj_norm = d_inv_sqrt @ (a_tilde @ d_inv_sqrt)
    return adj_norm @ (x @ weight)


if __name__ == "__main__":
    key = jax.random.PRNGKey(0)

    def make_case(k, n, f_in, f_out):
        k_adj, k_x, k_w = jax.random.split(k, 3)
        # Symmetric 0/1 adjacency without self-loops (forward adds I itself).
        a_raw = jax.random.uniform(k_adj, (n, n), dtype=jnp.float32)
        adj = ((a_raw + a_raw.T) * 0.5 > 0.7).astype(jnp.float32)
        adj = adj * (1.0 - jnp.eye(n, dtype=jnp.float32))
        x = jax.random.normal(k_x, (n, f_in), dtype=jnp.float32)
        # Matches reset_parameters(): uniform(-stdv, stdv), stdv = 1/sqrt(out_features).
        # (Bias exists in the module but is never used in forward, so not applied.)
        stdv = 1.0 / math.sqrt(f_out)
        w = jax.random.uniform(k_w, (f_in, f_out),
                               minval=-stdv, maxval=stdv, dtype=jnp.float32)
        return adj, x, w

    k1, k2, k3 = jax.random.split(key, 3)

    # Case 1: aligned N, 4x2 grid — exercises the k accumulation in the resident kernel.
    adj, x, w = make_case(k1, 512, 64, 16)
    out = jax.block_until_ready(graph_convolution(adj, x, w, tm=128, tk=256))
    ref = reference_gcn(adj, x, w)
    assert out.shape == ref.shape
    assert jnp.allclose(out, ref, atol=1e-3, rtol=1e-3), "case 1 mismatch vs reference"

    # Case 2: non-aligned N and F_out with a bf16 0/1 adjacency — exercises the ragged
    # last-tile column mask and the narrow-adjacency path (exact for 0/1 edges).
    adj, x, w = make_case(k2, 200, 32, 48)
    out = jax.block_until_ready(graph_convolution(adj.astype(jnp.bfloat16), x, w))
    ref = reference_gcn(adj, x, w)
    assert out.shape == ref.shape
    assert jnp.allclose(out, ref, atol=1e-3, rtol=1e-3), "case 2 mismatch vs reference"

    # Case 3: streaming-RHS fallback (resident budget forced to 0), 2x2 grid.
    adj, x, w = make_case(k3, 256, 48, 32)
    out = jax.block_until_ready(
        graph_convolution(adj, x, w, tm=128, tk=128, rhs_resident_max_bytes=0))
    ref = reference_gcn(adj, x, w)
    assert out.shape == ref.shape
    assert jnp.allclose(out, ref, atol=1e-3, rtol=1e-3), "case 3 mismatch vs reference"

    print("KERNEL_OK")
</pallas_src>

<mosaic_0001>
module attributes {stable_mosaic.version = 11 : i64} {
  func.func @_gcn_kernel_resident(%arg0: i32, %arg1: i32, %arg2: memref<128x1xf32, #tpu.memory_space<vmem>>, %arg3: memref<128x256xf32, #tpu.memory_space<vmem>>, %arg4: memref<512x128xf32, #tpu.memory_space<vmem>>, %arg5: memref<128x128xf32, #tpu.memory_space<vmem>>) attributes {dimension_semantics = [#tpu.dimension_semantics<parallel>, #tpu.dimension_semantics<arbitrary>], iteration_bounds = array<i64: 4, 2>, scalar_prefetch = 0 : i64, scratch_operands = 0 : i64, tpu.core_type = #tpu.core_type<tc>, window_params = [{transform_indices = @transform_0, window_bounds = array<i64: 128, 1>}, {transform_indices = @transform_1, window_bounds = array<i64: 128, 256>}, {pipeline_mode = #tpu.pipeline_mode<synchronous>, transform_indices = @transform_2, window_bounds = array<i64: 512, 128>}, {transform_indices = @transform_3, window_bounds = array<i64: 128, 128>}]} {
    %c0_i32 = arith.constant 0 : i32
    %0 = arith.cmpi eq, %arg1, %c0_i32 : i32
    %1 = arith.extui %0 : i1 to i32
    %c0_i32_0 = arith.constant 0 : i32
    %2 = arith.cmpi ne, %1, %c0_i32_0 : i32
    scf.if %2 {
      %cst_8 = arith.constant 0.000000e+00 : f32
      %15 = vector.broadcast %cst_8 : f32 to vector<128x128xf32>
      %c0_9 = arith.constant 0 : index
      %c0_10 = arith.constant 0 : index
      %16 = vector.load %arg5[%c0_9, %c0_10] : memref<128x128xf32, #tpu.memory_space<vmem>>, vector<128x128xf32>
      tpu.vector_store %arg5[%c0_9, %c0_10], %15 {strides = array<i32>} : memref<128x128xf32, #tpu.memory_space<vmem>>, vector<128x128xf32>,
    } else {
    }
    %c0 = arith.constant 0 : index
    %c0_1 = arith.constant 0 : index
    %3 = vector.load %arg3[%c0, %c0_1] : memref<128x256xf32, #tpu.memory_space<vmem>>, vector<128x256xf32>
    %c256_i32 = arith.constant 256 : i32
    %4 = arith.muli %arg1, %c256_i32 : i32
    %5 = tpu.assume_multiple %4, 128 : i32
    %6 = arith.index_cast %5 : i32 to index
    %c0_2 = arith.constant 0 : index
    %7 = vector.load %arg4[%6, %c0_2] : memref<512x128xf32, #tpu.memory_space<vmem>>, vector<256x128xf32>
    %c0_3 = arith.constant 0 : index
    %c0_4 = arith.constant 0 : index
    %8 = vector.load %arg5[%c0_3, %c0_4] : memref<128x128xf32, #tpu.memory_space<vmem>>, vector<128x128xf32>
    %cst = arith.constant dense<0.000000e+00> : vector<128x128xf32>
    %9 = tpu.matmul %3, %7, %cst {dimension_numbers = #tpu.dot_dimension_numbers<[1], [0], [0], [1], [0, 0, 1, 1], [], []>} : vector<128x256xf32>, vector<256x128xf32>, vector<128x128xf32> -> vector<128x128xf32>
    %10 = arith.addf %8, %9 : vector<128x128xf32>
    %c0_5 = arith.constant 0 : index
    %c0_6 = arith.constant 0 : index
    %11 = vector.load %arg5[%c0_5, %c0_6] : memref<128x128xf32, #tpu.memory_space<vmem>>, vector<128x128xf32>
    tpu.vector_store %arg5[%c0_5, %c0_6], %10 {strides = array<i32>} : memref<128x128xf32, #tpu.memory_space<vmem>>, vector<128x128xf32>,
    %c1_i32 = arith.constant 1 : i32
    %12 = arith.cmpi eq, %arg1, %c1_i32 : i32
    %13 = arith.extui %12 : i1 to i32
    %c0_i32_7 = arith.constant 0 : i32
    %14 = arith.cmpi ne, %13, %c0_i32_7 : i32
    scf.if %14 {
      %c128_i32 = arith.constant 128 : i32
      %15 = arith.muli %arg0, %c128_i32 : i32
      %16 = tpu.assume_multiple %15, 128 : i32
      %17 = arith.index_cast %16 : i32 to index
      %c0_8 = arith.constant 0 : index
      %18 = vector.load %arg4[%17, %c0_8] : memref<512x128xf32, #tpu.memory_space<vmem>>, vector<128x128xf32>
      %c0_9 = arith.constant 0 : index
      %c0_10 = arith.constant 0 : index
      %19 = vector.load %arg2[%c0_9, %c0_10] : memref<128x1xf32, #tpu.memory_space<vmem>>, vector<128x1xf32>
      %c0_11 = arith.constant 0 : index
      %c0_12 = arith.constant 0 : index
      %20 = vector.load %arg5[%c0_11, %c0_12] : memref<128x128xf32, #tpu.memory_space<vmem>>, vector<128x128xf32>
      %21 = arith.addf %20, %18 : vector<128x128xf32>
      %22 = vector.broadcast %19 : vector<128x1xf32> to vector<128x128xf32>
      %23 = arith.mulf %22, %21 : vector<128x128xf32>
      %c0_13 = arith.constant 0 : index
      %c0_14 = arith.constant 0 : index
      %24 = vector.load %arg5[%c0_13, %c0_14] : memref<128x128xf32, #tpu.memory_space<vmem>>, vector<128x128xf32>
      tpu.vector_store %arg5[%c0_13, %c0_14], %23 {strides = array<i32>} : memref<128x128xf32, #tpu.memory_space<vmem>>, vector<128x128xf32>,
    } else {
    }
    return
  }
  func.func @transform_0(%arg0: i32, %arg1: i32) -> (i32, i32) {
    %c0_i32 = arith.constant 0 : i32
    %c0_i32_0 = arith.constant 0 : i32
    return %arg0, %c0_i32 : i32, i32
  }
  func.func @transform_1(%arg0: i32, %arg1: i32) -> (i32, i32) {
    %c0_i32 = arith.constant 0 : i32
    return %arg0, %arg1 : i32, i32
  }
  func.func @transform_2(%arg0: i32, %arg1: i32) -> (i32, i32) {
    %c0_i32 = arith.constant 0 : i32
    %c0_i32_0 = arith.constant 0 : i32
    %c0_i32_1 = arith.constant 0 : i32
    return %c0_i32, %c0_i32_0 : i32, i32
  }
  func.func @transform_3(%arg0: i32, %arg1: i32) -> (i32, i32) {
    %c0_i32 = arith.constant 0 : i32
    %c0_i32_0 = arith.constant 0 : i32
    return %arg0, %c0_i32 : i32, i32
  }
}

</mosaic_0001>

<bundles_post_ra>
// kernel: graph_convolution.1
= control target key start
LH: loop header
LB: loop body
LE: loop exit
PB: predicated region body
PF: predicated region fallthrough
CT: control target
= control target key end

     0   :  { %s1121_s12 = smov 0   ;;  %s1123_s13 = smov 0   ;;  %s1476_s0 = inlined_call_operand.vmem [shape: f32[512,1], index: 0, kind: input, shape index: {}]   ;;  %s1477_s1 = inlined_call_operand.vmem [shape: f32[512,512], index: 1, kind: input, shape index: {}]   ;;  %s1478_s2 = inlined_call_operand.vmem [shape: f32[512,128], index: 2, kind: input, shape index: {}]   ;;  %s1479_s3 = inlined_call_operand.vmem [shape: f32[512,128], index: 3, kind: output, shape index: {}]  }
   0x1   :  { %s1125_s14 = smov 0   ;;  %s1127_s15 = smov 0  }
   0x2   :  { %s1129_s16 = smov 0   ;;  %s1131_s17 = smov 0  }
   0x3   :  { %s1133_s18 = smov 0  }
   0x4 LB: > { %s22_s19 = sadd.s32 1, %s1089_s16  ;;  %s25_s20 = sadd.s32 1, %s1093_s17  ;;  %s1097_s18 = sphi %s1133_s18, %s13_s18   ;;  %s1093_s17 = sphi %s1131_s17, %s1485_s17   ;;  %s1089_s16 = sphi %s1129_s16, %s1484_s16   ;;  %s1085_s15 = sphi %s1127_s15, %s1483_s15   ;;  %s1081_s14 = sphi %s1125_s14, %s1482_s14   ;;  %s1077_s13 = sphi %s1123_s13, %s1481_s13   ;;  %s1073_s12 = sphi %s1121_s12, %s1480_s12  }
   0x5   : > { %p23_p0 = scmp.ge.s32.totalorder %s22_s19, 2  ;;  %p67_p1 = scmp.ne.s32.totalorder %s1077_s13, %s1073_s12 }
   0x6   : > { %p68_p2 = scmp.eq.s32.totalorder %s1097_s18, 0  ;;  %s60_s24 = sadd.s32 1, %s1077_s13 }
   0x7   : > { %s1487_s19 = smov (%p23_p0, %s22_s19), 0  ;;  %s1489_s20 = smov (!%p23_p0, %s25_s20), %s1093_s17 }
   0x8   : > { %p69_p3 = por %p68_p2, %p67_p1  ;;  %p27_p4 = scmp.ge.s32.totalorder %s1489_s20, 4 }
   0x9   : > { %s56_s21 = ssub.s32 %s1089_s16, %s1487_s19  ;;  %p852_p6 = scmp.ge.s32.totalorder %s1097_s18, 8 }
   0xa   : > { %s1491_s20 = smov (%p27_p4, %s1489_s20), 0 }
   0xb   : > { %s55_s22 = ssub.s32 %s1093_s17, %s1491_s20  ;;  %143 = sbr.rel (%p852_p6) target bundleno = 39 (0x27), region = 20 }
   0xc   : > { %s57_s23 = sor.u32 %s56_s21, %s55_s22 }
   0xd   : > { %p58_p5 = scmp.eq.s32.totalorder %s57_s23, 0 }
   0xf   : > { %s1172_s25 = scalar_select %p58_p5, %s1077_s13, %s60_s24  }
  0x10   : > { %155 = sbr.rel (!%p69_p3) target bundleno = 39 (0x27), region = 28  ;;  %s157_s26 = sand.u32 (%p69_p3), 1, %s1077_s13  }
  0x11   : > { %s855_s27 = sshll.u32 (%p69_p3), %s1089_s16, 1  ;;  %s853_s28 = sshll.u32 (%p69_p3), %s157_s26, 8 }
  0x12   : > { %s870_s29 = sshll.u32 (%p69_p3), %s1093_s17, 6  ;;  %s1186_s8 = scalar_lea.vmem (%p69_p3), [#allocation2], %s853_s28 }
  0x13   : > { %s163_s30 = sadd.s32 (%p69_p3), %s870_s29, %s855_s27 }
  0x14   : > { %s857_s4 = sshll.u32 (%p69_p3), %s163_s30, 3 }
  0x15   : > { %s1181_s7 = scalar_lea.vmem %s1477_s1, %s857_s4 }
  0x16   : > { %v178_v0 = vld [vmem:[%s1181_s7] sm:$0xff]  ;;  %v180_v1 = vld [vmem:[%s1181_s7 + $0x8] sm:$0xff] }
  0x17   : > { %v182_v2 = vld [vmem:[%s1181_s7 + $0x20] sm:$0xff]  ;;  %179 = vst [vmem:[%s1186_s8] sm:$0xff] %v178_v0  ;;  %181 = vst [vmem:[%s1186_s8 + $0x8] sm:$0xff] %v180_v1  ;;  %v184_v3 = vld [vmem:[%s1181_s7 + $0x28] sm:$0xff] }
  0x18   : > { %183 = vst [vmem:[%s1186_s8 + $0x10] sm:$0xff] %v182_v2  ;;  %v186_v4 = vld [vmem:[%s1181_s7 + $0x40] sm:$0xff]  ;;  %v188_v5 = vld [vmem:[%s1181_s7 + $0x48] sm:$0xff]  ;;  %185 = vst [vmem:[%s1186_s8 + $0x18] sm:$0xff] %v184_v3 }
  0x19   : > { %187 = vst [vmem:[%s1186_s8 + $0x20] sm:$0xff] %v186_v4  ;;  %189 = vst [vmem:[%s1186_s8 + $0x28] sm:$0xff] %v188_v5  ;;  %v190_v6 = vld [vmem:[%s1181_s7 + $0x60] sm:$0xff]  ;;  %v192_v7 = vld [vmem:[%s1181_s7 + $0x68] sm:$0xff] }
  0x1a   : > { %v194_v8 = vld [vmem:[%s1181_s7 + $0x80] sm:$0xff]  ;;  %191 = vst [vmem:[%s1186_s8 + $0x30] sm:$0xff] %v190_v6  ;;  %193 = vst [vmem:[%s1186_s8 + $0x38] sm:$0xff] %v192_v7  ;;  %v196_v9 = vld [vmem:[%s1181_s7 + $0x88] sm:$0xff] }
  0x1b   : > { %195 = vst [vmem:[%s1186_s8 + $0x40] sm:$0xff] %v194_v8  ;;  %v198_v10 = vld [vmem:[%s1181_s7 + $0xa0] sm:$0xff]  ;;  %v200_v11 = vld [vmem:[%s1181_s7 + $0xa8] sm:$0xff]  ;;  %197 = vst [vmem:[%s1186_s8 + $0x48] sm:$0xff] %v196_v9 }
  0x1c   : > { %199 = vst [vmem:[%s1186_s8 + $0x50] sm:$0xff] %v198_v10  ;;  %201 = vst [vmem:[%s1186_s8 + $0x58] sm:$0xff] %v200_v11  ;;  %v202_v12 = vld [vmem:[%s1181_s7 + $0xc0] sm:$0xff]  ;;  %v204_v13 = vld [vmem:[%s1181_s7 + $0xc8] sm:$0xff] }
  0x1d   : > { %v206_v14 = vld [vmem:[%s1181_s7 + $0xe0] sm:$0xff]  ;;  %203 = vst [vmem:[%s1186_s8 + $0x60] sm:$0xff] %v202_v12  ;;  %205 = vst [vmem:[%s1186_s8 + $0x68] sm:$0xff] %v204_v13  ;;  %v208_v15 = vld [vmem:[%s1181_s7 + $0xe8] sm:$0xff] }
  0x1e   : > { %207 = vst [vmem:[%s1186_s8 + $0x70] sm:$0xff] %v206_v14  ;;  %v210_v16 = vld [vmem:[%s1181_s7 + $0x100] sm:$0xff]  ;;  %v212_v17 = vld [vmem:[%s1181_s7 + $0x108] sm:$0xff]  ;;  %209 = vst [vmem:[%s1186_s8 + $0x78] sm:$0xff] %v208_v15 }
  0x1f   : > { %211 = vst [vmem:[%s1186_s8 + $0x80] sm:$0xff] %v210_v16  ;;  %213 = vst [vmem:[%s1186_s8 + $0x88] sm:$0xff] %v212_v17  ;;  %v214_v18 = vld [vmem:[%s1181_s7 + $0x120] sm:$0xff]  ;;  %v216_v19 = vld [vmem:[%s1181_s7 + $0x128] sm:$0xff] }
  0x20   : > { %v218_v20 = vld [vmem:[%s1181_s7 + $0x140] sm:$0xff]  ;;  %215 = vst [vmem:[%s1186_s8 + $0x90] sm:$0xff] %v214_v18  ;;  %217 = vst [vmem:[%s1186_s8 + $0x98] sm:$0xff] %v216_v19  ;;  %v220_v21 = vld [vmem:[%s1181_s7 + $0x148] sm:$0xff] }
  0x21   : > { %219 = vst [vmem:[%s1186_s8 + $0xa0] sm:$0xff] %v218_v20  ;;  %v222_v22 = vld [vmem:[%s1181_s7 + $0x160] sm:$0xff]  ;;  %v224_v23 = vld [vmem:[%s1181_s7 + $0x168] sm:$0xff]  ;;  %221 = vst [vmem:[%s1186_s8 + $0xa8] sm:$0xff] %v220_v21 }
  0x22   : > { %223 = vst [vmem:[%s1186_s8 + $0xb0] sm:$0xff] %v222_v22  ;;  %225 = vst [vmem:[%s1186_s8 + $0xb8] sm:$0xff] %v224_v23  ;;  %v226_v24 = vld [vmem:[%s1181_s7 + $0x180] sm:$0xff]  ;;  %v228_v25 = vld [vmem:[%s1181_s7 + $0x188] sm:$0xff] }
  0x23   : > { %v230_v26 = vld [vmem:[%s1181_s7 + $0x1a0] sm:$0xff]  ;;  %227 = vst [vmem:[%s1186_s8 + $0xc0] sm:$0xff] %v226_v24  ;;  %229 = vst [vmem:[%s1186_s8 + $0xc8] sm:$0xff] %v228_v25  ;;  %v232_v27 = vld [vmem:[%s1181_s7 + $0x1a8] sm:$0xff] }
  0x24   : > { %231 = vst [vmem:[%s1186_s8 + $0xd0] sm:$0xff] %v230_v26  ;;  %v234_v28 = vld [vmem:[%s1181_s7 + $0x1c0] sm:$0xff]  ;;  %v236_v29 = vld [vmem:[%s1181_s7 + $0x1c8] sm:$0xff]  ;;  %233 = vst [vmem:[%s1186_s8 + $0xd8] sm:$0xff] %v232_v27 }
  0x25   : > { %235 = vst [vmem:[%s1186_s8 + $0xe0] sm:$0xff] %v234_v28  ;;  %237 = vst [vmem:[%s1186_s8 + $0xe8] sm:$0xff] %v236_v29  ;;  %v238_v30 = vld [vmem:[%s1181_s7 + $0x1e0] sm:$0xff]  ;;  %v240_v31 = vld [vmem:[%s1181_s7 + $0x1e8] sm:$0xff] }
  0x26   : > { %239 = vst [vmem:[%s1186_s8 + $0xf0] sm:$0xff] %v238_v30  ;;  %241 = vst [vmem:[%s1186_s8 + $0xf8] sm:$0xff] %v240_v31 }
  0x27 PF: > { %p858_p7 = scmp.ge.s32.totalorder %s1097_s18, 1  ;;  %p246_p8 = scmp.lt.s32.totalorder %s1097_s18, 9 }
  0x29   : > { %p247_p9 = pnand %p858_p7, %p246_p8 }
  0x2a   : > { %s253_s9 = sand.u32 (!%p247_p9), 1, %s1073_s12   ;;  %s860_s10 = sshll.u32 (!%p247_p9), %s1085_s15, 4 }
  0x2b   : > { %250 = sbr.rel (%p247_p9) target bundleno = 482 (0x1e2), region = 51  ;;  %s859_s11 = sshll.u32 (!%p247_p9), %s253_s9, 8 }
  0x2c   : > { %p282_p10 = scmp.lt.s32.totalorder (!%p247_p9), %s860_s10, 63  ;;  %s1263_s29 = scalar_lea.vmem (!%p247_p9), [#allocation2], %s859_s11 }
  0x2d   : > { %p864_p11 = scmp.ne.s32.totalorder (!%p247_p9), %s1081_s14, 0 }
  0x30   : > { %s1493_s10 = smov (!%p282_p10, %s860_s10), 63  ;;  %298 = sbr.rel (%p864_p11) target bundleno = 62 (0x3e), region = 59 }
  0x31   : > { %s861_s21 = sshll.u32 %s1493_s10, 3 }
  0x32   : > { %s1256_s24 = scalar_lea.vmem %s1476_s0, %s861_s21  ;;  %s1261_s28 = scalar_lea.vmem %s1479_s3, %s861_s21 }
  0x35   : > { %v1099_v32 = vmov 0.0  }
  0x36   : > { %299 = vst [vmem:[%s1261_s28] sm:$0xff] %v1099_v32  ;;  %300 = vst [vmem:[%s1261_s28 + $0x8] sm:$0xff] %v1099_v32 }
  0x37   : > { %301 = vst [vmem:[%s1261_s28 + $0x10] sm:$0xff] %v1099_v32  ;;  %302 = vst [vmem:[%s1261_s28 + $0x18] sm:$0xff] %v1099_v32 }
  0x38   : > { %303 = vst [vmem:[%s1261_s28 + $0x20] sm:$0xff] %v1099_v32  ;;  %304 = vst [vmem:[%s1261_s28 + $0x28] sm:$0xff] %v1099_v32 }
  0x39   : > { %305 = vst [vmem:[%s1261_s28 + $0x30] sm:$0xff] %v1099_v32  ;;  %306 = vst [vmem:[%s1261_s28 + $0x38] sm:$0xff] %v1099_v32 }
  0x3a   : > { %307 = vst [vmem:[%s1261_s28 + $0x40] sm:$0xff] %v1099_v32  ;;  %308 = vst [vmem:[%s1261_s28 + $0x48] sm:$0xff] %v1099_v32 }
  0x3b   : > { %309 = vst [vmem:[%s1261_s28 + $0x50] sm:$0xff] %v1099_v32  ;;  %310 = vst [vmem:[%s1261_s28 + $0x58] sm:$0xff] %v1099_v32 }
  0x3c   : > { %311 = vst [vmem:[%s1261_s28 + $0x60] sm:$0xff] %v1099_v32  ;;  %312 = vst [vmem:[%s1261_s28 + $0x68] sm:$0xff] %v1099_v32 }
  0x3d   : > { %313 = vst [vmem:[%s1261_s28 + $0x70] sm:$0xff] %v1099_v32  ;;  %314 = vst [vmem:[%s1261_s28 + $0x78] sm:$0xff] %v1099_v32 }
  0x3e PF: > { %s865_s12 = sshll.u32 %s1081_s14, 8  ;;  %v316_v33 = vld [vmem:[%s1263_s29 + $0x8] sm:$0xff]  ;;  %v315_v3 = vld [vmem:[%s1263_s29] sm:$0xff]  ;;  %v318_v5 = vld [vmem:[%s1263_s29 + $0x18] sm:$0xff]  ;;  %p866_p12 = scmp.ne.s32.totalorder %s1081_s14, 1 }
  0x3f   : > { %v332_v34 = vld [vmem:[%s1263_s29 + $0x88] sm:$0xff]  ;;  %s1288_s5 = scalar_lea.vmem %s1478_s2, %s865_s12  ;;  %461 = vmatprep.mubr.f32.mxu0 %v316_v33  ;;  %v331_v4 = vld [vmem:[%s1263_s29 + $0x80] sm:$0xff]  ;;  %v334_v6 = vld [vmem:[%s1263_s29 + $0x98] sm:$0xff]  ;;  %s867_s14 = sshll.u32 (!%p866_p12), %s1085_s15, 7 }
  0x40   : > { %501 = vmatprep.mubr.f32.mxu1 %v332_v34  ;;  %v380_v35 = vld [vmem:[%s1288_s5 + $0xf8] sm:$0xff]  ;;  %v379_v37 = vld [vmem:[%s1288_s5 + $0xf0] sm:$0xff]  ;;  %v378_v39 = vld [vmem:[%s1288_s5 + $0xe8] sm:$0xff]  ;;  %s1405_s8 = scalar_lea.vmem (!%p866_p12), %s1478_s2, %s867_s14 }
  0x41   : > { %v364_v36 = vld [vmem:[%s1288_s5 + $0x78] sm:$0xff]  ;;  %871 = vmatprep.subr.mxu0 %v380_v35  ;;  %951 = vmatprep.subr.mxu1 %v380_v35  ;;  %v363_v38 = vld [vmem:[%s1288_s5 + $0x70] sm:$0xff]  ;;  %v362_v40 = vld [vmem:[%s1288_s5 + $0x68] sm:$0xff] }
  0x42   : > { %872 = vmatpush3.msra.mxu0 %v364_v36  ;;  %967 = vmatpush3.msra.mxu1 %v364_v36  ;;  %v377_v41 = vld [vmem:[%s1288_s5 + $0xe0] sm:$0xff]  ;;  %v376_v43 = vld [vmem:[%s1288_s5 + $0xd8] sm:$0xff]  ;;  %v375_v45 = vld [vmem:[%s1288_s5 + $0xd0] sm:$0xff] }
  0x43   : > { %873 = vmatprep.subr.mxu0 %v379_v37  ;;  %952 = vmatprep.subr.mxu1 %v379_v37  ;;  %v361_v42 = vld [vmem:[%s1288_s5 + $0x60] sm:$0xff]  ;;  %v360_v44 = vld [vmem:[%s1288_s5 + $0x58] sm:$0xff]  ;;  %v359_v46 = vld [vmem:[%s1288_s5 + $0x50] sm:$0xff] }
  0x44   : > { %874 = vmatpush3.msra.mxu0 %v363_v38  ;;  %968 = vmatpush3.msra.mxu1 %v363_v38  ;;  %v374_v47 = vld [vmem:[%s1288_s5 + $0xc8] sm:$0xff]  ;;  %v373_v49 = vld [vmem:[%s1288_s5 + $0xc0] sm:$0xff]  ;;  %v372_v51 = vld [vmem:[%s1288_s5 + $0xb8] sm:$0xff] }
  0x45   : > { %875 = vmatprep.subr.mxu0 %v378_v39  ;;  %953 = vmatprep.subr.mxu1 %v378_v39  ;;  %v358_v48 = vld [vmem:[%s1288_s5 + $0x48] sm:$0xff]  ;;  %v357_v50 = vld [vmem:[%s1288_s5 + $0x40] sm:$0xff]  ;;  %v356_v52 = vld [vmem:[%s1288_s5 + $0x38] sm:$0xff] }
  0x46   : > { %876 = vmatpush3.msra.mxu0 %v362_v40  ;;  %969 = vmatpush3.msra.mxu1 %v362_v40  ;;  %v371_v53 = vld [vmem:[%s1288_s5 + $0xb0] sm:$0xff]  ;;  %v370_v55 = vld [vmem:[%s1288_s5 + $0xa8] sm:$0xff]  ;;  %v369_v57 = vld [vmem:[%s1288_s5 + $0xa0] sm:$0xff] }
  0x47   : > { %877 = vmatprep.subr.mxu0 %v377_v41  ;;  %954 = vmatprep.subr.mxu1 %v377_v41  ;;  %v355_v54 = vld [vmem:[%s1288_s5 + $0x30] sm:$0xff]  ;;  %v354_v56 = vld [vmem:[%s1288_s5 + $0x28] sm:$0xff]  ;;  %v353_v58 = vld [vmem:[%s1288_s5 + $0x20] sm:$0xff] }
  0x48   : > { %878 = vmatpush3.msra.mxu0 %v361_v42  ;;  %970 = vmatpush3.msra.mxu1 %v361_v42  ;;  %v368_v59 = vld [vmem:[%s1288_s5 + $0x98] sm:$0xff]  ;;  %v367_v61 = vld [vmem:[%s1288_s5 + $0x90] sm:$0xff]  ;;  %v366_v63 = vld [vmem:[%s1288_s5 + $0x88] sm:$0xff] }
  0x49   : > { %879 = vmatprep.subr.mxu0 %v376_v43  ;;  %955 = vmatprep.subr.mxu1 %v376_v43  ;;  %v352_v60 = vld [vmem:[%s1288_s5 + $0x18] sm:$0xff]  ;;  %v351_v62 = vld [vmem:[%s1288_s5 + $0x10] sm:$0xff]  ;;  %v350_v0 = vld [vmem:[%s1288_s5 + $0x8] sm:$0xff] }
  0x4a   : > { %880 = vmatpush3.msra.mxu0 %v360_v44  ;;  %971 = vmatpush3.msra.mxu1 %v360_v44  ;;  %v365_v1 = vld [vmem:[%s1288_s5 + $0x80] sm:$0xff]  ;;  %v317_v7 = vld [vmem:[%s1263_s29 + $0x10] sm:$0xff]  ;;  %v320_v9 = vld [vmem:[%s1263_s29 + $0x28] sm:$0xff] }
  0x4b   : > { %881 = vmatprep.subr.mxu0 %v375_v45  ;;  %956 = vmatprep.subr.mxu1 %v375_v45  ;;  %v349_v2 = vld [vmem:[%s1288_s5] sm:$0xff]  ;;  %v333_v8 = vld [vmem:[%s1263_s29 + $0x90] sm:$0xff]  ;;  %v336_v10 = vld [vmem:[%s1263_s29 + $0xa8] sm:$0xff] }
  0x4c   : > { %882 = vmatpush3.msra.mxu0 %v359_v46  ;;  %972 = vmatpush3.msra.mxu1 %v359_v46  ;;  %v319_v11 = vld [vmem:[%s1263_s29 + $0x20] sm:$0xff]  ;;  %v322_v13 = vld [vmem:[%s1263_s29 + $0x38] sm:$0xff]  ;;  %v321_v15 = vld [vmem:[%s1263_s29 + $0x30] sm:$0xff] }
  0x4d   : > { %883 = vmatprep.subr.mxu0 %v374_v47  ;;  %957 = vmatprep.subr.mxu1 %v374_v47  ;;  %v335_v12 = vld [vmem:[%s1263_s29 + $0xa0] sm:$0xff]  ;;  %v338_v14 = vld [vmem:[%s1263_s29 + $0xb8] sm:$0xff]  ;;  %v337_v16 = vld [vmem:[%s1263_s29 + $0xb0] sm:$0xff] }
  0x4e   : > { %884 = vmatpush3.msra.mxu0 %v358_v48  ;;  %973 = vmatpush3.msra.mxu1 %v358_v48  ;;  %v324_v17 = vld [vmem:[%s1263_s29 + $0x48] sm:$0xff]  ;;  %v323_v19 = vld [vmem:[%s1263_s29 + $0x40] sm:$0xff]  ;;  %v326_v21 = vld [vmem:[%s1263_s29 + $0x58] sm:$0xff] }
  0x4f   : > { %885 = vmatprep.subr.mxu0 %v373_v49  ;;  %958 = vmatprep.subr.mxu1 %v373_v49  ;;  %v340_v18 = vld [vmem:[%s1263_s29 + $0xc8] sm:$0xff]  ;;  %v339_v20 = vld [vmem:[%s1263_s29 + $0xc0] sm:$0xff]  ;;  %v342_v22 = vld [vmem:[%s1263_s29 + $0xd8] sm:$0xff] }
  0x50   : > { %886 = vmatpush3.msra.mxu0 %v357_v50  ;;  %974 = vmatpush3.msra.mxu1 %v357_v50  ;;  %v325_v23 = vld [vmem:[%s1263_s29 + $0x50] sm:$0xff]  ;;  %v328_v25 = vld [vmem:[%s1263_s29 + $0x68] sm:$0xff]  ;;  %v327_v27 = vld [vmem:[%s1263_s29 + $0x60] sm:$0xff] }
  0x51   : > { %887 = vmatprep.subr.mxu0 %v372_v51  ;;  %959 = vmatprep.subr.mxu1 %v372_v51  ;;  %v341_v24 = vld [vmem:[%s1263_s29 + $0xd0] sm:$0xff]  ;;  %v344_v26 = vld [vmem:[%s1263_s29 + $0xe8] sm:$0xff]  ;;  %v343_v28 = vld [vmem:[%s1263_s29 + $0xe0] sm:$0xff] }
  0x52   : > { %888 = vmatpush3.msra.mxu0 %v356_v52  ;;  %975 = vmatpush3.msra.mxu1 %v356_v52  ;;  %v330_v29 = vld [vmem:[%s1263_s29 + $0x78] sm:$0xff]  ;;  %v329_v31 = vld [vmem:[%s1263_s29 + $0x70] sm:$0xff]  ;;  %v381_v35 = vld [vmem:[%s1261_s28] sm:$0xff] }
  0x53   : > { %889 = vmatprep.subr.mxu0 %v371_v53  ;;  %960 = vmatprep.subr.mxu1 %v371_v53  ;;  %v346_v30 = vld [vmem:[%s1263_s29 + $0xf8] sm:$0xff]  ;;  %v345_v32 = vld [vmem:[%s1263_s29 + $0xf0] sm:$0xff]  ;;  %v389_v37 = vld [vmem:[%s1261_s28 + $0x40] sm:$0xff] }
  0x54   : > { %890 = vmatpush3.msra.mxu0 %v355_v54  ;;  %976 = vmatpush3.msra.mxu1 %v355_v54  ;;  %v382_v45 = vld [vmem:[%s1261_s28 + $0x8] sm:$0xff] }
  0x55   : > { %891 = vmatprep.subr.mxu0 %v370_v55  ;;  %961 = vmatprep.subr.mxu1 %v370_v55  ;;  %v390_v47 = vld [vmem:[%s1261_s28 + $0x48] sm:$0xff]  ;;  %v383_v55 = vld [vmem:[%s1261_s28 + $0x10] sm:$0xff] }
  0x56   : > { %892 = vmatpush3.msra.mxu0 %v354_v56  ;;  %977 = vmatpush3.msra.mxu1 %v354_v56 }
  0x57   : > { %893 = vmatprep.subr.mxu0 %v369_v57  ;;  %962 = vmatprep.subr.mxu1 %v369_v57  ;;  %v391_v57 = vld [vmem:[%s1261_s28 + $0x50] sm:$0xff] }
  0x58   : > { %894 = vmatpush3.msra.mxu0 %v353_v58  ;;  %978 = vmatpush3.msra.mxu1 %v353_v58 }
  0x59   : > { %895 = vmatprep.subr.mxu0 %v368_v59  ;;  %963 = vmatprep.subr.mxu1 %v368_v59 }
  0x5a   : > { %896 = vmatpush3.msra.mxu0 %v352_v60  ;;  %979 = vmatpush3.msra.mxu1 %v352_v60 }
  0x5b   : > { %897 = vmatprep.subr.mxu0 %v367_v61  ;;  %964 = vmatprep.subr.mxu1 %v367_v61 }
  0x5c   : > { %898 = vmatpush3.msra.mxu0 %v351_v62  ;;  %980 = vmatpush3.msra.mxu1 %v351_v62 }
  0x5d   : > { %899 = vmatprep.subr.mxu0 %v366_v63  ;;  %965 = vmatprep.subr.mxu1 %v366_v63 }
  0x5e   : > { %900 = vmatpush3.msra.mxu0 %v350_v0  ;;  %981 = vmatpush3.msra.mxu1 %v350_v0 }
  0x5f   : > { %901 = vmatprep.subr.mxu0 %v365_v1  ;;  %966 = vmatprep.subr.mxu1 %v365_v1  ;;  %v384_v1 = vld [vmem:[%s1261_s28 + $0x18] sm:$0xff] }
  0x60   : > { %902 = vmatpush3.msra.mxu0 %v349_v2  ;;  %982 = vmatpush3.msra.mxu1 %v349_v2 }
  0x61   : > { %462 = vmatmul.mubr.f32.vlgmr.msra.gmra.mxu0 %v315_v3  ;;  %502 = vmatmul.mubr.f32.vlgmr.msra.gmra.mxu1 %v331_v4  ;;  %v392_v3 = vld [vmem:[%s1261_s28 + $0x58] sm:$0xff] }
  0x62   : > { %466 = vmatprep.mubr.f32.mxu0 %v318_v5  ;;  %506 = vmatprep.mubr.f32.mxu1 %v334_v6 }
  0x65   : > { %467 = vmatmul.mubr.f32.gmra.mxu0 %v317_v7  ;;  %507 = vmatmul.mubr.f32.gmra.mxu1 %v333_v8 }
  0x66   : > { %471 = vmatprep.mubr.f32.mxu0 %v320_v9  ;;  %511 = vmatprep.mubr.f32.mxu1 %v336_v10 }
  0x69   : > { %472 = vmatmul.mubr.f32.gmra.mxu0 %v319_v11  ;;  %512 = vmatmul.mubr.f32.gmra.mxu1 %v335_v12  ;;  %v385_v11 = vld [vmem:[%s1261_s28 + $0x20] sm:$0xff] }
  0x6a   : > { %476 = vmatprep.mubr.f32.mxu0 %v322_v13  ;;  %516 = vmatprep.mubr.f32.mxu1 %v338_v14  ;;  %v393_v13 = vld [vmem:[%s1261_s28 + $0x60] sm:$0xff] }
  0x6d   : > { %477 = vmatmul.mubr.f32.gmra.mxu0 %v321_v15  ;;  %517 = vmatmul.mubr.f32.gmra.mxu1 %v337_v16 }
  0x6e   : > { %481 = vmatprep.mubr.f32.mxu0 %v324_v17  ;;  %521 = vmatprep.mubr.f32.mxu1 %v340_v18 }
  0x71   : > { %482 = vmatmul.mubr.f32.gmra.mxu0 %v323_v19  ;;  %522 = vmatmul.mubr.f32.gmra.mxu1 %v339_v20 }
  0x72   : > { %486 = vmatprep.mubr.f32.mxu0 %v326_v21  ;;  %526 = vmatprep.mubr.f32.mxu1 %v342_v22  ;;  %v386_v21 = vld [vmem:[%s1261_s28 + $0x28] sm:$0xff] }
  0x75   : > { %487 = vmatmul.mubr.f32.gmra.mxu0 %v325_v23  ;;  %527 = vmatmul.mubr.f32.gmra.mxu1 %v341_v24  ;;  %v394_v23 = vld [vmem:[%s1261_s28 + $0x68] sm:$0xff] }
  0x76   : > { %491 = vmatprep.mubr.f32.mxu0 %v328_v25  ;;  %531 = vmatprep.mubr.f32.mxu1 %v344_v26 }
  0x79   : > { %492 = vmatmul.mubr.f32.gmra.mxu0 %v327_v27  ;;  %532 = vmatmul.mubr.f32.gmra.mxu1 %v343_v28 }
  0x7a   : > { %496 = vmatprep.mubr.f32.mxu0 %v330_v29  ;;  %536 = vmatprep.mubr.f32.mxu1 %v346_v30 }
  0x7d   : > { %497 = vmatmul.mubr.f32.gmra.mxu0 %v329_v31  ;;  %537 = vmatmul.mubr.f32.gmra.mxu1 %v345_v32  ;;  %v387_v31 = vld [vmem:[%s1261_s28 + $0x30] sm:$0xff] }
 0x121   : > { %v903_v33 = vpop.f32.mrf.mxu0  ;;  %v927_v34 = vpop.f32.mrf.mxu1 }
 0x123   : > { %v904_v36 = vpop.f32.mrf.mxu0  ;;  %v928_v38 = vpop.f32.mrf.mxu1 }
 0x124   : > { %v905_v39 = vadd.f32 %v904_v36, %v903_v33  ;;  %v929_v40 = vadd.f32 %v928_v38, %v927_v34  ;;  %v395_v33 = vld [vmem:[%s1261_s28 + $0x70] sm:$0xff] }
 0x125   : > { %v906_v41 = vpop.f32.mrf.mxu0  ;;  %v930_v42 = vpop.f32.mrf.mxu1 }
 0x126   : > { %v542_v43 = vadd.f32 %v905_v39, %v381_v35  ;;  %v550_v44 = vadd.f32 %v929_v40, %v389_v37 }
 0x127   : > { %v907_v46 = vpop.f32.mrf.mxu0  ;;  %v931_v48 = vpop.f32.mrf.mxu1 }
 0x128   : > { %558 = vst [vmem:[%s1261_s28] sm:$0xff] %v542_v43  ;;  %566 = vst [vmem:[%s1261_s28 + $0x40] sm:$0xff] %v550_v44  ;;  %v908_v49 = vadd.f32 %v907_v46, %v906_v41  ;;  %v932_v50 = vadd.f32 %v931_v48, %v930_v42  ;;  %v388_v41 = vld [vmem:[%s1261_s28 + $0x38] sm:$0xff] }
 0x129   : > { %v909_v51 = vpop.f32.mrf.mxu0  ;;  %v933_v52 = vpop.f32.mrf.mxu1  ;;  %v396_v43 = vld [vmem:[%s1261_s28 + $0x78] sm:$0xff] }
 0x12a   : > { %v543_v53 = vadd.f32 %v908_v49, %v382_v45  ;;  %v551_v54 = vadd.f32 %v932_v50, %v390_v47 }
 0x12b   : > { %v910_v56 = vpop.f32.mrf.mxu0  ;;  %v934_v58 = vpop.f32.mrf.mxu1 }
 0x12c   : > { %559 = vst [vmem:[%s1261_s28 + $0x8] sm:$0xff] %v543_v53  ;;  %567 = vst [vmem:[%s1261_s28 + $0x48] sm:$0xff] %v551_v54  ;;  %v911_v59 = vadd.f32 %v910_v56, %v909_v51  ;;  %v935_v60 = vadd.f32 %v934_v58, %v933_v52 }
 0x12d   : > { %v912_v61 = vpop.f32.mrf.mxu0  ;;  %v936_v62 = vpop.f32.mrf.mxu1 }
 0x12e   : > { %v544_v63 = vadd.f32 %v911_v59, %v383_v55  ;;  %v552_v0 = vadd.f32 %v935_v60, %v391_v57 }
 0x12f   : > { %v913_v2 = vpop.f32.mrf.mxu0  ;;  %v937_v4 = vpop.f32.mrf.mxu1 }
 0x130   : > { %560 = vst [vmem:[%s1261_s28 + $0x10] sm:$0xff] %v544_v63  ;;  %568 = vst [vmem:[%s1261_s28 + $0x50] sm:$0xff] %v552_v0  ;;  %v914_v5 = vadd.f32 %v913_v2, %v912_v61  ;;  %v938_v6 = vadd.f32 %v937_v4, %v936_v62 }
 0x131   : > { %v915_v7 = vpop.f32.mrf.mxu0  ;;  %v939_v8 = vpop.f32.mrf.mxu1 }
 0x132   : > { %v545_v9 = vadd.f32 %v914_v5, %v384_v1  ;;  %v553_v10 = vadd.f32 %v938_v6, %v392_v3 }
 0x133   : > { %v916_v12 = vpop.f32.mrf.mxu0  ;;  %v940_v14 = vpop.f32.mrf.mxu1 }
 0x134   : > { %561 = vst [vmem:[%s1261_s28 + $0x18] sm:$0xff] %v545_v9  ;;  %569 = vst [vmem:[%s1261_s28 + $0x58] sm:$0xff] %v553_v10  ;;  %v917_v15 = vadd.f32 %v916_v12, %v915_v7  ;;  %v941_v16 = vadd.f32 %v940_v14, %v939_v8 }
 0x135   : > { %v918_v17 = vpop.f32.mrf.mxu0  ;;  %v942_v18 = vpop.f32.mrf.mxu1 }
 0x136   : > { %v546_v19 = vadd.f32 %v917_v15, %v385_v11  ;;  %v554_v20 = vadd.f32 %v941_v16, %v393_v13 }
 0x137   : > { %v919_v22 = vpop.f32.mrf.mxu0  ;;  %v943_v24 = vpop.f32.mrf.mxu1 }
 0x138   : > { %562 = vst [vmem:[%s1261_s28 + $0x20] sm:$0xff] %v546_v19  ;;  %570 = vst [vmem:[%s1261_s28 + $0x60] sm:$0xff] %v554_v20  ;;  %v920_v25 = vadd.f32 %v919_v22, %v918_v17  ;;  %v944_v26 = vadd.f32 %v943_v24, %v942_v18 }
 0x139   : > { %v921_v27 = vpop.f32.mrf.mxu0  ;;  %v945_v28 = vpop.f32.mrf.mxu1 }
 0x13a   : > { %v547_v29 = vadd.f32 %v920_v25, %v386_v21  ;;  %v555_v30 = vadd.f32 %v944_v26, %v394_v23 }
 0x13b   : > { %v922_v32 = vpop.f32.mrf.mxu0  ;;  %v946_v34 = vpop.f32.mrf.mxu1 }
 0x13c   : > { %563 = vst [vmem:[%s1261_s28 + $0x28] sm:$0xff] %v547_v29  ;;  %571 = vst [vmem:[%s1261_s28 + $0x68] sm:$0xff] %v555_v30  ;;  %v923_v35 = vadd.f32 %v922_v32, %v921_v27  ;;  %v947_v36 = vadd.f32 %v946_v34, %v945_v28 }
 0x13d   : > { %v924_v37 = vpop.f32.mrf.mxu0  ;;  %v948_v38 = vpop.f32.mrf.mxu1 }
 0x13e   : > { %v548_v39 = vadd.f32 %v923_v35, %v387_v31  ;;  %v556_v40 = vadd.f32 %v947_v36, %v395_v33 }
 0x13f   : > { %v925_v42 = vpop.f32.mrf.mxu0  ;;  %v949_v44 = vpop.f32.mrf.mxu1 }
 0x140   : > { %564 = vst [vmem:[%s1261_s28 + $0x30] sm:$0xff] %v548_v39  ;;  %572 = vst [vmem:[%s1261_s28 + $0x70] sm:$0xff] %v556_v40  ;;  %v926_v45 = vadd.f32 %v925_v42, %v924_v37  ;;  %v950_v46 = vadd.f32 %v949_v44, %v948_v38  ;;  %577 = sbr.rel (%p866_p12) target bundleno = 482 (0x1e2), region = 63 }
 0x142   : > { %v549_v47 = vadd.f32 %v926_v45, %v388_v41  ;;  %v557_v48 = vadd.f32 %v950_v46, %v396_v43 }
 0x144   : > { %565 = vst [vmem:[%s1261_s28 + $0x38] sm:$0xff] %v549_v47  ;;  %573 = vst [vmem:[%s1261_s28 + $0x78] sm:$0xff] %v557_v48 }
 0x145   : > { %v598_v49 = vld [vmem:[%s1256_s24 + $0x10] sm:$0xff]  ;;  %v596_v50 = vld [vmem:[%s1256_s24] sm:$0xff]  ;;  %v1100_v51 = vmov 0   ;;  %v599_v52 = vld [vmem:[%s1256_s24 + $0x18] sm:$0xff] }
 0x146   : > { %1042 = vset.pattern.permute.xlu1 %v1100_v51  ;;  %1041 = vset.pattern.permute.xlu0 %v1100_v51  ;;  %v597_v53 = vld [vmem:[%s1256_s24 + $0x8] sm:$0xff]  ;;  %v600_v55 = vld [vmem:[%s1256_s24 + $0x20] sm:$0xff]  ;;  %v603_v56 = vld [vmem:[%s1256_s24 + $0x38] sm:$0xff] }
 0x147   : > { %656 = vperm.xlu1 %1042, %v598_v49   ;;  %646 = vperm.xlu0 %1041, %v596_v50   ;;  %v601_v54 = vld [vmem:[%s1256_s24 + $0x28] sm:$0xff]  ;;  %v602_v57 = vld [vmem:[%s1256_s24 + $0x30] sm:$0xff]  ;;  %v604_v59 = vld [vmem:[%s1256_s24 + $0x40] sm:$0xff] }
 0x148   : > { %v605_v58 = vld [vmem:[%s1256_s24 + $0x48] sm:$0xff]  ;;  %v607_v60 = vld [vmem:[%s1256_s24 + $0x58] sm:$0xff]  ;;  %v606_v61 = vld [vmem:[%s1256_s24 + $0x50] sm:$0xff] }
 0x149   : > { %v609_v62 = vld [vmem:[%s1256_s24 + $0x68] sm:$0xff]  ;;  %v608_v63 = vld [vmem:[%s1256_s24 + $0x60] sm:$0xff]  ;;  %v611_v0 = vld [vmem:[%s1256_s24 + $0x78] sm:$0xff] }
 0x14a   : > { %v610_v1 = vld [vmem:[%s1256_s24 + $0x70] sm:$0xff]  ;;  %v612_v4 = vld [vmem:[%s1261_s28] sm:$0xff]  ;;  %v615_v8 = vld [vmem:[%s1261_s28 + $0x18] sm:$0xff] }
 0x14b   : > { %661 = vperm.xlu1 %1042, %v599_v52   ;;  %651 = vperm.xlu0 %1041, %v597_v53   ;;  %v614_v2 = vld [vmem:[%s1261_s28 + $0x10] sm:$0xff]  ;;  %v580_v5 = vld [vmem:[%s1405_s8] sm:$0xff]  ;;  %v583_v9 = vld [vmem:[%s1405_s8 + $0x18] sm:$0xff] }
 0x14c   : > { %v582_v3 = vld [vmem:[%s1405_s8 + $0x10] sm:$0xff]  ;;  %v628_v7 = vadd.f32 %v612_v4, %v580_v5  ;;  %v613_v10 = vld [vmem:[%s1261_s28 + $0x8] sm:$0xff]  ;;  %v631_v16 = vadd.f32 %v615_v8, %v583_v9  ;;  %v616_v20 = vld [vmem:[%s1261_s28 + $0x20] sm:$0xff] }
 0x14d   : > { %v630_v6 = vadd.f32 %v614_v2, %v582_v3  ;;  %v581_v11 = vld [vmem:[%s1405_s8 + $0x8] sm:$0xff]  ;;  %v584_v21 = vld [vmem:[%s1405_s8 + $0x20] sm:$0xff]  ;;  %v619_v28 = vld [vmem:[%s1261_s28 + $0x38] sm:$0xff] }
 0x14e   : > { %v629_v17 = vadd.f32 %v613_v10, %v581_v11  ;;  %v617_v18 = vld [vmem:[%s1261_s28 + $0x28] sm:$0xff]  ;;  %v632_v27 = vadd.f32 %v616_v20, %v584_v21  ;;  %v587_v29 = vld [vmem:[%s1405_s8 + $0x38] sm:$0xff]  ;;  %v618_v30 = vld [vmem:[%s1261_s28 + $0x30] sm:$0xff] }
 0x14f   : > { %671 = vperm.xlu1 %1042, %v601_v54   ;;  %666 = vperm.xlu0 %1041, %v600_v55   ;;  %v585_v19 = vld [vmem:[%s1405_s8 + $0x28] sm:$0xff]  ;;  %v586_v31 = vld [vmem:[%s1405_s8 + $0x30] sm:$0xff]  ;;  %v635_v36 = vadd.f32 %v619_v28, %v587_v29  ;;  %v620_v40 = vld [vmem:[%s1261_s28 + $0x40] sm:$0xff] }
 0x150   : > { %v633_v26 = vadd.f32 %v617_v18, %v585_v19  ;;  %v634_v37 = vadd.f32 %v618_v30, %v586_v31  ;;  %v621_v38 = vld [vmem:[%s1261_s28 + $0x48] sm:$0xff]  ;;  %v588_v41 = vld [vmem:[%s1405_s8 + $0x40] sm:$0xff]  ;;  %v623_v48 = vld [vmem:[%s1261_s28 + $0x58] sm:$0xff] }
 0x151   : > { %v589_v39 = vld [vmem:[%s1405_s8 + $0x48] sm:$0xff]  ;;  %v636_v47 = vadd.f32 %v620_v40, %v588_v41  ;;  %v591_v49 = vld [vmem:[%s1405_s8 + $0x58] sm:$0xff]  ;;  %v622_v50 = vld [vmem:[%s1261_s28 + $0x50] sm:$0xff] }
 0x152   : > { %v637_v46 = vadd.f32 %v621_v38, %v589_v39  ;;  %v590_v51 = vld [vmem:[%s1405_s8 + $0x50] sm:$0xff]  ;;  %v627_v4 = vld [vmem:[%s1261_s28 + $0x78] sm:$0xff] }
 0x153   : > { %681 = vperm.xlu1 %1042, %v603_v56   ;;  %676 = vperm.xlu0 %1041, %v602_v57   ;;  %v639_v56 = vadd.f32 %v623_v48, %v591_v49  ;;  %v638_v57 = vadd.f32 %v622_v50, %v590_v51  ;;  %v595_v5 = vld [vmem:[%s1405_s8 + $0x78] sm:$0xff] }
 0x157   : > { %691 = vperm.xlu1 %1042, %v605_v58   ;;  %686 = vperm.xlu0 %1041, %v604_v59   ;;  %v625_v58 = vld [vmem:[%s1261_s28 + $0x68] sm:$0xff] }
 0x158   : > { %v593_v59 = vld [vmem:[%s1405_s8 + $0x68] sm:$0xff] }
 0x159   : > { %v641_v2 = vadd.f32 %v625_v58, %v593_v59 }
 0x15b   : > { %701 = vperm.xlu1 %1042, %v607_v60   ;;  %696 = vperm.xlu0 %1041, %v606_v61   ;;  %v624_v60 = vld [vmem:[%s1261_s28 + $0x60] sm:$0xff] }
 0x15c   : > { %v592_v61 = vld [vmem:[%s1405_s8 + $0x60] sm:$0xff] }
 0x15d   : > { %v640_v3 = vadd.f32 %v624_v60, %v592_v61 }
 0x15f   : > { %711 = vperm.xlu1 %1042, %v609_v62   ;;  %706 = vperm.xlu0 %1041, %v608_v63  }
 0x163   : > { %721 = vperm.xlu1 %1042, %v611_v0   ;;  %716 = vperm.xlu0 %1041, %v610_v1  }
 0x1c2   : > { %v657_v12 = vpop.permute.xlu1 %656  ;;  %v647_v13 = vpop.permute.xlu0 %646 }
 0x1c3   : > { %v726_v14 = vmul.f32 %v657_v12, %v630_v6  ;;  %v724_v15 = vmul.f32 %v647_v13, %v628_v7  ;;  %v626_v6 = vld [vmem:[%s1261_s28 + $0x70] sm:$0xff]  ;;  %v643_v12 = vadd.f32 %v627_v4, %v595_v5 }
 0x1c4   : > { %v594_v7 = vld [vmem:[%s1405_s8 + $0x70] sm:$0xff] }
 0x1c5   : > { %742 = vst [vmem:[%s1261_s28 + $0x10] sm:$0xff] %v726_v14  ;;  %740 = vst [vmem:[%s1261_s28] sm:$0xff] %v724_v15  ;;  %v642_v13 = vadd.f32 %v626_v6, %v594_v7 }
 0x1c6   : > { %v662_v22 = vpop.permute.xlu1 %661  ;;  %v652_v23 = vpop.permute.xlu0 %651 }
 0x1c7   : > { %v727_v24 = vmul.f32 %v662_v22, %v631_v16  ;;  %v725_v25 = vmul.f32 %v652_v23, %v629_v17 }
 0x1c9   : > { %743 = vst [vmem:[%s1261_s28 + $0x18] sm:$0xff] %v727_v24  ;;  %741 = vst [vmem:[%s1261_s28 + $0x8] sm:$0xff] %v725_v25 }
 0x1ca   : > { %v672_v32 = vpop.permute.xlu1 %671  ;;  %v667_v33 = vpop.permute.xlu0 %666 }
 0x1cb   : > { %v729_v34 = vmul.f32 %v672_v32, %v633_v26  ;;  %v728_v35 = vmul.f32 %v667_v33, %v632_v27 }
 0x1cd   : > { %745 = vst [vmem:[%s1261_s28 + $0x28] sm:$0xff] %v729_v34  ;;  %744 = vst [vmem:[%s1261_s28 + $0x20] sm:$0xff] %v728_v35 }
 0x1ce   : > { %v682_v42 = vpop.permute.xlu1 %681  ;;  %v677_v43 = vpop.permute.xlu0 %676 }
 0x1cf   : > { %v731_v44 = vmul.f32 %v682_v42, %v635_v36  ;;  %v730_v45 = vmul.f32 %v677_v43, %v634_v37 }
 0x1d1   : > { %747 = vst [vmem:[%s1261_s28 + $0x38] sm:$0xff] %v731_v44  ;;  %746 = vst [vmem:[%s1261_s28 + $0x30] sm:$0xff] %v730_v45 }
 0x1d2   : > { %v692_v52 = vpop.permute.xlu1 %691  ;;  %v687_v53 = vpop.permute.xlu0 %686 }
 0x1d3   : > { %v733_v54 = vmul.f32 %v692_v52, %v637_v46  ;;  %v732_v55 = vmul.f32 %v687_v53, %v636_v47 }
 0x1d5   : > { %749 = vst [vmem:[%s1261_s28 + $0x48] sm:$0xff] %v733_v54  ;;  %748 = vst [vmem:[%s1261_s28 + $0x40] sm:$0xff] %v732_v55 }
 0x1d6   : > { %v702_v62 = vpop.permute.xlu1 %701  ;;  %v697_v63 = vpop.permute.xlu0 %696 }
 0x1d7   : > { %v735_v0 = vmul.f32 %v702_v62, %v639_v56  ;;  %v734_v1 = vmul.f32 %v697_v63, %v638_v57 }
 0x1d9   : > { %751 = vst [vmem:[%s1261_s28 + $0x58] sm:$0xff] %v735_v0  ;;  %750 = vst [vmem:[%s1261_s28 + $0x50] sm:$0xff] %v734_v1 }
 0x1da   : > { %v712_v8 = vpop.permute.xlu1 %711  ;;  %v707_v9 = vpop.permute.xlu0 %706 }
 0x1db   : > { %v737_v10 = vmul.f32 %v712_v8, %v641_v2  ;;  %v736_v11 = vmul.f32 %v707_v9, %v640_v3 }
 0x1dd   : > { %753 = vst [vmem:[%s1261_s28 + $0x68] sm:$0xff] %v737_v10  ;;  %752 = vst [vmem:[%s1261_s28 + $0x60] sm:$0xff] %v736_v11 }
 0x1de   : > { %v722_v14 = vpop.permute.xlu1 %721  ;;  %v717_v15 = vpop.permute.xlu0 %716 }
 0x1df   : > { %v739_v16 = vmul.f32 %v722_v14, %v643_v12  ;;  %v738_v17 = vmul.f32 %v717_v15, %v642_v13 }
 0x1e1   : > { %755 = vst [vmem:[%s1261_s28 + $0x78] sm:$0xff] %v739_v16  ;;  %754 = vst [vmem:[%s1261_s28 + $0x70] sm:$0xff] %v738_v17 }
 0x1e2 PF: > { %s13_s18 = sadd.s32 1, %s1097_s18   ;;  %s1480_s12 = smov %s1077_s13 }
 0x1e3   : > { %p10_p13 = scmp.ge.s32.totalorder %s13_s18, 10   ;;  %s1481_s13 = smov %s1172_s25 }
 0x1e4   : > { %s1482_s14 = smov %s1089_s16  ;;  %s1483_s15 = smov %s1093_s17 }
 0x1e5   : > { %s1484_s16 = smov %s1487_s19  ;;  %s1485_s17 = smov %s1491_s20 }
 0x1e6   :  { %12 = sbr.rel (!%p10_p13) target bundleno = 4 (0x4), region = 103 }

</bundles_post_ra>
